<compile_context>
chip_gen: v7x
topology: tpu7x:2x2x1
jax: 0.10.0
libtpu: 0.0.40
codegen_flags: <defaults>
</compile_context>

<pallas_src>
import functools

import jax
import jax.numpy as jnp
from jax.experimental import pallas as pl
from jax.experimental.pallas import tpu as pltpu


def _round_up(x, m):
    return (x + m - 1) // m * m


def _clip_loss_kernel(ab_ref, out_ref, col_m, col_l, cap_acc, pick_acc, *,
                      n_valid, n_pad, d_pad, tm, inv_t):
    i = pl.program_id(0)
    r0 = pl.multiple_of(i * tm, tm)
    neg = jnp.float32(-1e30)

    # ---- init streaming accumulators on the first row stripe ----
    @pl.when(i == 0)
    def _init():
        col_m[...] = jnp.full_like(col_m, neg)
        col_l[...] = jnp.zeros_like(col_l)
        cap_acc[...] = jnp.zeros_like(cap_acc)
        pick_acc[...] = jnp.zeros_like(pick_acc)

    ab_all = ab_ref[...]                       # (n_pad, 2*d_pad) bf16, resident
    a_all = ab_all[:, :d_pad]                  # emb_im1 (lane-aligned slice)
    ab_row = ab_ref[pl.ds(r0, tm), :]          # (tm, 2*d_pad) current row stripe
    b_row = ab_row[:, d_pad:]                  # emb_im2 rows of this stripe
    a_row = ab_row[:, :d_pad]                  # emb_im1 rows of this stripe

    # A @ B.T without materializing B.T (contract feature dim of both sides).
    contract_t = (((1,), (1,)), ((), ()))

    # logits stripe: rows [r0, r0+tm) of (emb1 @ emb2.T) / T     -> (tm, n_pad)
    logits = jax.lax.dot_general(
        a_row, ab_all[:, d_pad:], contract_t,
        preferred_element_type=jnp.float32) * inv_t
    # fused similarity stripe: ([a|b] @ [a|b].T) * 0.5 / T       -> (tm, n_pad)
    s = jax.lax.dot_general(
        ab_row, ab_all, contract_t,
        preferred_element_type=jnp.float32) * (0.5 * inv_t)

    # ---- validity masks for padded rows / columns ----
    col_ids = jax.lax.broadcasted_iota(jnp.int32, (tm, n_pad), 1)
    row_ids = jax.lax.broadcasted_iota(jnp.int32, (tm, n_pad), 0) + r0
    valid = jnp.logical_and(row_ids < n_valid, col_ids < n_valid)
    logits_m = jnp.where(valid, logits, neg)
    s_m = jnp.where(valid, s, neg)
    row_valid = (jax.lax.broadcasted_iota(jnp.int32, (tm, 1), 0) + r0) < n_valid

    # ---- captions CE (row direction; full row lives in this stripe) ----
    m1 = jnp.max(logits_m, axis=-1, keepdims=True)
    lse1 = m1 + jnp.log(jnp.sum(jnp.exp(logits_m - m1), axis=-1, keepdims=True))

    rmax = jnp.max(s_m, axis=-1, keepdims=True)
    labels = jnp.min(jnp.where(s_m == rmax, col_ids, n_pad),
                     axis=-1, keepdims=True)              # first-occurrence argmax
    onehot = (col_ids == labels).astype(jnp.float32)      # (tm, n_pad)
    picked1 = jnp.sum(onehot * logits_m, axis=-1, keepdims=True)

    cap_acc[...] += jnp.sum(jnp.where(row_valid, lse1 - picked1, 0.0),
                            axis=(0, 1), keepdims=True)

    # ---- images CE numerator term: picked2[j] = logits[labels[j], j] ----
    # One-hot gather on the MXU: a_gather[j] = emb1[labels[j]]
    a_gather = jnp.dot(onehot.astype(ab_all.dtype), a_all,
                       preferred_element_type=jnp.float32)        # (tm, d_pad)
    picked2 = jnp.sum(a_gather * b_row.astype(jnp.float32),
                      axis=-1, keepdims=True) * inv_t             # (tm, 1)
    pick_acc[...] += jnp.sum(jnp.where(row_valid, picked2, 0.0),
                             axis=(0, 1), keepdims=True)

    # ---- images CE denominator: column LSE streamed across row stripes ----
    blk_max = jnp.max(logits_m, axis=0, keepdims=True)            # (1, n_pad)
    new_m = jnp.maximum(col_m[...], blk_max)
    col_l[...] = col_l[...] * jnp.exp(col_m[...] - new_m) + jnp.sum(
        jnp.exp(logits_m - new_m), axis=0, keepdims=True)
    col_m[...] = new_m

    # ---- finalize on the last stripe ----
    @pl.when(i == pl.num_programs(0) - 1)
    def _finalize():
        col_lse = col_m[...] + jnp.log(col_l[...])                # (1, n_pad)
        cvalid = jax.lax.broadcasted_iota(jnp.int32, (1, n_pad), 1) < n_valid
        img_sum = jnp.sum(jnp.where(cvalid, col_lse, 0.0),
                          axis=(0, 1), keepdims=True) - pick_acc[...]
        out_ref[...] = (cap_acc[...] + img_sum) * (0.5 / n_valid)


def clip_loss(emb_im1, emb_im2, temperature=1.0, mxu_dtype=jnp.bfloat16):
    """Pallas-TPU CLIP loss. emb_im1, emb_im2: (N, D) arrays -> scalar f32."""
    assert emb_im1.ndim == 2 and emb_im1.shape == emb_im2.shape
    n, d = emb_im1.shape
    d_pad = _round_up(d, 128)
    n_pad = _round_up(n, 128)
    tm = 256 if n_pad % 256 == 0 else 128
    grid = (n_pad // tm,)

    def pad_cast(x):
        x = jnp.pad(x.astype(jnp.float32), ((0, n_pad - n), (0, d_pad - d)))
        return x.astype(mxu_dtype)

    # Feature-dim concat done once in the wrapper: [emb1 | emb2]  (n_pad, 2*d_pad)
    ab = jnp.concatenate([pad_cast(emb_im1), pad_cast(emb_im2)], axis=1)

    kernel = functools.partial(
        _clip_loss_kernel, n_valid=n, n_pad=n_pad, d_pad=d_pad, tm=tm,
        inv_t=1.0 / float(temperature))

    cost = pl.CostEstimate(
        flops=8 * n_pad * n_pad * d_pad,            # logits + fused-S + gather matmuls
        transcendentals=2 * n_pad * n_pad,          # row + column exps
        bytes_accessed=n_pad * 2 * d_pad * jnp.dtype(mxu_dtype).itemsize + 4)

    out = pl.pallas_call(
        kernel,
        out_shape=jax.ShapeDtypeStruct((1, 1), jnp.float32),
        grid_spec=pltpu.PrefetchScalarGridSpec(
            num_scalar_prefetch=0,
            grid=grid,
            in_specs=[pl.BlockSpec((n_pad, 2 * d_pad), lambda i: (0, 0))],
            out_specs=pl.BlockSpec((1, 1), lambda i: (0, 0)),
            scratch_shapes=[
                pltpu.VMEM((1, n_pad), jnp.float32),   # running column max
                pltpu.VMEM((1, n_pad), jnp.float32),   # running column sum-exp
                pltpu.VMEM((1, 1), jnp.float32),       # captions-CE accumulator
                pltpu.VMEM((1, 1), jnp.float32),       # picked-logit accumulator
            ]),
        compiler_params=pltpu.CompilerParams(
            # TODO(synk): the stripe axis must stay 'arbitrary' because the column-LSE
            # accumulators are carried across stripes; a v7x 2-TensorCore split would
            # need per-core partial LSEs plus a tiny combine step.
            dimension_semantics=("arbitrary",),
            vmem_limit_bytes=64 * 1024 * 1024),
        cost_estimate=cost,
    )(ab)
    return out[0, 0]


def _clip_loss_ref(emb_im1, emb_im2, temperature=1.0):
    """Pure-JAX reference mirroring the PyTorch module."""
    logits = (emb_im1 @ emb_im2.T) / temperature
    images_similarity = emb_im2 @ emb_im2.T
    captions_similarity = emb_im1 @ emb_im1.T
    targets = jax.nn.softmax(
        (captions_similarity + images_similarity) / (2 * temperature), axis=-1)
    labels = jnp.argmax(targets, axis=-1)

    def ce(lg, lb):
        logp = jax.nn.log_softmax(lg, axis=-1)
        return -jnp.mean(jnp.take_along_axis(logp, lb[:, None], axis=-1))

    return (ce(logits, labels) + ce(logits.T, labels)) / 2


if __name__ == "__main__":
    N, D = 8, 32  # small batch of paired embeddings
    key = jax.random.PRNGKey(0)
    k1, k2 = jax.random.split(key)
    emb_im1 = jax.random.normal(k1, (N, D), dtype=jnp.float32)
    emb_im2 = jax.random.normal(k2, (N, D), dtype=jnp.float32)

    loss = clip_loss(emb_im1, emb_im2, temperature=1.0)
    jax.block_until_ready(loss)

    # Tight check vs. a reference fed the same bf16-quantized operands
    # (the kernel feeds the MXU bf16 with f32 accumulation, per perf guidance).
    q1 = emb_im1.astype(jnp.bfloat16).astype(jnp.float32)
    q2 = emb_im2.astype(jnp.bfloat16).astype(jnp.float32)
    ref_q = _clip_loss_ref(q1, q2, temperature=1.0)
    assert jnp.allclose(loss, ref_q, rtol=1e-3, atol=1e-3), (loss, ref_q)

    # Loose check vs. the full-f32 reference (bf16 MXU feed -> small deviation).
    ref = _clip_loss_ref(emb_im1, emb_im2, temperature=1.0)
    assert jnp.allclose(loss, ref, rtol=3e-2, atol=3e-2), (loss, ref)

    print("KERNEL_OK")
</pallas_src>

<mosaic_0001>
module attributes {stable_mosaic.version = 11 : i64} {
  func.func @_clip_loss_kernel(%arg0: i32, %arg1: memref<128x256xbf16, #tpu.memory_space<vmem>>, %arg2: memref<1x1xf32, #tpu.memory_space<vmem>>, %arg3: memref<1x128xf32, #tpu.memory_space<vmem>>, %arg4: memref<1x128xf32, #tpu.memory_space<vmem>>, %arg5: memref<1x1xf32, #tpu.memory_space<vmem>>, %arg6: memref<1x1xf32, #tpu.memory_space<vmem>>) attributes {dimension_semantics = [#tpu.dimension_semantics<arbitrary>], iteration_bounds = array<i64: 1>, scalar_prefetch = 0 : i64, scratch_operands = 4 : i64, tpu.core_type = #tpu.core_type<tc>, window_params = [{pipeline_mode = #tpu.pipeline_mode<synchronous>, transform_indices = @transform_0, window_bounds = array<i64: 128, 256>}, {pipeline_mode = #tpu.pipeline_mode<synchronous>, transform_indices = @transform_1, window_bounds = array<i64: 1, 1>}]} {
    %c128_i32 = arith.constant 128 : i32
    %0 = arith.muli %arg0, %c128_i32 : i32
    %1 = tpu.assume_multiple %0, 128 : i32
    %c0_i32 = arith.constant 0 : i32
    %2 = arith.cmpi eq, %arg0, %c0_i32 : i32
    %3 = arith.extui %2 : i1 to i32
    %cst = arith.constant -1.000000e+30 : f32
    %c0_i32_0 = arith.constant 0 : i32
    %4 = arith.cmpi ne, %3, %c0_i32_0 : i32
    scf.if %4 {
      %109 = vector.broadcast %cst : f32 to vector<1x128xf32>
      %c0_46 = arith.constant 0 : index
      %c0_47 = arith.constant 0 : index
      %110 = vector.load %arg3[%c0_46, %c0_47] : memref<1x128xf32, #tpu.memory_space<vmem>>, vector<1x128xf32>
      tpu.vector_store %arg3[%c0_46, %c0_47], %109 {strides = array<i32>} : memref<1x128xf32, #tpu.memory_space<vmem>>, vector<1x128xf32>,
      %cst_48 = arith.constant 0.000000e+00 : f32
      %111 = vector.broadcast %cst_48 : f32 to vector<1x128xf32>
      %c0_49 = arith.constant 0 : index
      %c0_50 = arith.constant 0 : index
      %112 = vector.load %arg4[%c0_49, %c0_50] : memref<1x128xf32, #tpu.memory_space<vmem>>, vector<1x128xf32>
      tpu.vector_store %arg4[%c0_49, %c0_50], %111 {strides = array<i32>} : memref<1x128xf32, #tpu.memory_space<vmem>>, vector<1x128xf32>,
      %cst_51 = arith.constant 0.000000e+00 : f32
      %113 = vector.broadcast %cst_51 : f32 to vector<1x1xf32>
      %c0_52 = arith.constant 0 : index
      %c0_53 = arith.constant 0 : index
      %114 = vector.load %arg5[%c0_52, %c0_53] : memref<1x1xf32, #tpu.memory_space<vmem>>, vector<1x1xf32>
      tpu.vector_store %arg5[%c0_52, %c0_53], %113 {strides = array<i32>} : memref<1x1xf32, #tpu.memory_space<vmem>>, vector<1x1xf32>,
      %cst_54 = arith.constant 0.000000e+00 : f32
      %115 = vector.broadcast %cst_54 : f32 to vector<1x1xf32>
      %c0_55 = arith.constant 0 : index
      %c0_56 = arith.constant 0 : index
      %116 = vector.load %arg6[%c0_55, %c0_56] : memref<1x1xf32, #tpu.memory_space<vmem>>, vector<1x1xf32>
      tpu.vector_store %arg6[%c0_55, %c0_56], %115 {strides = array<i32>} : memref<1x1xf32, #tpu.memory_space<vmem>>, vector<1x1xf32>,
    } else {
    }
    %c0 = arith.constant 0 : index
    %c0_1 = arith.constant 0 : index
    %5 = vector.load %arg1[%c0, %c0_1] : memref<128x256xbf16, #tpu.memory_space<vmem>>, vector<128x256xbf16>
    %6 = vector.extract_strided_slice %5 {offsets = [0, 0], sizes = [128, 128], strides = [1, 1]} : vector<128x256xbf16> to vector<128x128xbf16>
    %7 = arith.index_cast %1 : i32 to index
    %c0_2 = arith.constant 0 : index
    %8 = vector.load %arg1[%7, %c0_2] : memref<128x256xbf16, #tpu.memory_space<vmem>>, vector<128x256xbf16>
    %9 = vector.extract_strided_slice %8 {offsets = [0, 128], sizes = [128, 128], strides = [1, 1]} : vector<128x256xbf16> to vector<128x128xbf16>
    %10 = vector.extract_strided_slice %8 {offsets = [0, 0], sizes = [128, 128], strides = [1, 1]} : vector<128x256xbf16> to vector<128x128xbf16>
    %11 = vector.extract_strided_slice %5 {offsets = [0, 128], sizes = [128, 128], strides = [1, 1]} : vector<128x256xbf16> to vector<128x128xbf16>
    %cst_3 = arith.constant dense<0.000000e+00> : vector<128x128xf32>
    %12 = tpu.matmul %10, %11, %cst_3 {dimension_numbers = #tpu.dot_dimension_numbers<[1], [1], [0], [0], [0, 0, 1, 0], [], []>} : vector<128x128xbf16>, vector<128x128xbf16>, vector<128x128xf32> -> vector<128x128xf32>
    %cst_4 = arith.constant 1.000000e+00 : f32
    %13 = vector.broadcast %cst_4 : f32 to vector<128x128xf32>
    %14 = arith.mulf %12, %13 : vector<128x128xf32>
    %cst_5 = arith.constant dense<0.000000e+00> : vector<128x128xf32>
    %15 = tpu.matmul %8, %5, %cst_5 {dimension_numbers = #tpu.dot_dimension_numbers<[1], [1], [0], [0], [0, 0, 1, 0], [], []>} : vector<128x256xbf16>, vector<128x256xbf16>, vector<128x128xf32> -> vector<128x128xf32>
    %cst_6 = arith.constant 5.000000e-01 : f32
    %16 = vector.broadcast %cst_6 : f32 to vector<128x128xf32>
    %17 = arith.mulf %15, %16 : vector<128x128xf32>
    %18 = tpu.iota {dimensions = array<i32: 1>} : vector<128x128xi32>
    %19 = tpu.iota {dimensions = array<i32: 0>} : vector<128x128xi32>
    %20 = vector.broadcast %1 : i32 to vector<128x128xi32>
    %21 = arith.addi %19, %20 : vector<128x128xi32>
    %c8_i32 = arith.constant 8 : i32
    %22 = vector.broadcast %c8_i32 : i32 to vector<128x128xi32>
    %23 = arith.cmpi slt, %21, %22 : vector<128x128xi32>
    %c8_i32_7 = arith.constant 8 : i32
    %24 = vector.broadcast %c8_i32_7 : i32 to vector<128x128xi32>
    %25 = arith.cmpi slt, %18, %24 : vector<128x128xi32>
    %26 = arith.andi %23, %25 : vector<128x128xi1>
    %cst_8 = arith.constant -1.000000e+30 : f32
    %27 = vector.broadcast %cst_8 : f32 to vector<128x128xf32>
    %28 = arith.select %26, %14, %27 : vector<128x128xi1>, vector<128x128xf32>
    %cst_9 = arith.constant -1.000000e+30 : f32
    %29 = vector.broadcast %cst_9 : f32 to vector<128x128xf32>
    %30 = arith.select %26, %17, %29 : vector<128x128xi1>, vector<128x128xf32>
    %31 = tpu.iota {dimensions = array<i32: 0>} : vector<128x1xi32>
    %32 = vector.broadcast %1 : i32 to vector<128x1xi32>
    %33 = arith.addi %31, %32 : vector<128x1xi32>
    %c8_i32_10 = arith.constant 8 : i32
    %34 = vector.broadcast %c8_i32_10 : i32 to vector<128x1xi32>
    %35 = arith.cmpi slt, %33, %34 : vector<128x1xi32>
    %cst_11 = arith.constant dense<0xFF800000> : vector<128xf32>
    %36 = vector.multi_reduction <maximumf>, %28, %cst_11 [1] : vector<128x128xf32> to vector<128xf32>
    %37 = vector.shape_cast %36 : vector<128xf32> to vector<128x1xf32>
    %38 = vector.broadcast %37 : vector<128x1xf32> to vector<128x128xf32>
    %39 = arith.subf %28, %38 : vector<128x128xf32>
    %40 = math.exp %39 : vector<128x128xf32>
    %cst_12 = arith.constant dense<0.000000e+00> : vector<128xf32>
    %41 = vector.multi_reduction <add>, %40, %cst_12 [1] : vector<128x128xf32> to vector<128xf32>
    %42 = vector.shape_cast %41 : vector<128xf32> to vector<128x1xf32>
    %43 = math.log %42 : vector<128x1xf32>
    %44 = arith.addf %37, %43 : vector<128x1xf32>
    %cst_13 = arith.constant dense<0xFF800000> : vector<128xf32>
    %45 = vector.multi_reduction <maximumf>, %30, %cst_13 [1] : vector<128x128xf32> to vector<128xf32>
    %46 = vector.shape_cast %45 : vector<128xf32> to vector<128x1xf32>
    %47 = vector.broadcast %46 : vector<128x1xf32> to vector<128x128xf32>
    %48 = arith.cmpf oeq, %30, %47 : vector<128x128xf32>
    %c128_i32_14 = arith.constant 128 : i32
    %49 = vector.broadcast %c128_i32_14 : i32 to vector<128x128xi32>
    %50 = arith.select %48, %18, %49 : vector<128x128xi1>, vector<128x128xi32>
    %cst_15 = arith.constant dense<2147483647> : vector<128xi32>
    %51 = vector.multi_reduction <minsi>, %50, %cst_15 [1] : vector<128x128xi32> to vector<128xi32>
    %52 = vector.shape_cast %51 : vector<128xi32> to vector<128x1xi32>
    %53 = vector.broadcast %52 : vector<128x1xi32> to vector<128x128xi32>
    %54 = arith.cmpi eq, %18, %53 : vector<128x128xi32>
    %55 = arith.extui %54 : vector<128x128xi1> to vector<128x128xi32>
    %56 = arith.sitofp %55 : vector<128x128xi32> to vector<128x128xf32>
    %57 = arith.mulf %56, %28 : vector<128x128xf32>
    %cst_16 = arith.constant dense<0.000000e+00> : vector<128xf32>
    %58 = vector.multi_reduction <add>, %57, %cst_16 [1] : vector<128x128xf32> to vector<128xf32>
    %59 = vector.shape_cast %58 : vector<128xf32> to vector<128x1xf32>
    %c0_17 = arith.constant 0 : index
    %c0_18 = arith.constant 0 : index
    %60 = vector.load %arg5[%c0_17, %c0_18] : memref<1x1xf32, #tpu.memory_space<vmem>>, vector<1x1xf32>
    %61 = arith.subf %44, %59 : vector<128x1xf32>
    %cst_19 = arith.constant 0.000000e+00 : f32
    %62 = vector.broadcast %cst_19 : f32 to vector<128x1xf32>
    %63 = arith.select %35, %61, %62 : vector<128x1xi1>, vector<128x1xf32>
    %64 = vector.shape_cast %63 : vector<128x1xf32> to vector<1x128x1xf32>
    %cst_20 = arith.constant dense<0.000000e+00> : vector<1xf32>
    %65 = vector.multi_reduction <add>, %64, %cst_20 [1, 2] : vector<1x128x1xf32> to vector<1xf32>
    %66 = vector.shape_cast %65 : vector<1xf32> to vector<1x1x1xf32>
    %67 = vector.extract %66[0, 0, 0] : f32 from vector<1x1x1xf32>
    %68 = vector.broadcast %67 : f32 to vector<1x1xf32>
    %69 = arith.addf %60, %68 : vector<1x1xf32>
    %c0_21 = arith.constant 0 : index
    %c0_22 = arith.constant 0 : index
    %70 = vector.load %arg5[%c0_21, %c0_22] : memref<1x1xf32, #tpu.memory_space<vmem>>, vector<1x1xf32>
    tpu.vector_store %arg5[%c0_21, %c0_22], %69 {strides = array<i32>} : memref<1x1xf32, #tpu.memory_space<vmem>>, vector<1x1xf32>,
    %71 = arith.truncf %56 : vector<128x128xf32> to vector<128x128xbf16>
    %cst_23 = arith.constant dense<0.000000e+00> : vector<128x128xf32>
    %72 = tpu.matmul %71, %6, %cst_23 {dimension_numbers = #tpu.dot_dimension_numbers<[1], [0], [0], [1], [0, 0, 1, 1], [], []>} : vector<128x128xbf16>, vector<128x128xbf16>, vector<128x128xf32> -> vector<128x128xf32>
    %73 = arith.extf %9 : vector<128x128xbf16> to vector<128x128xf32>
    %74 = arith.mulf %72, %73 : vector<128x128xf32>
    %cst_24 = arith.constant dense<0.000000e+00> : vector<128xf32>
    %75 = vector.multi_reduction <add>, %74, %cst_24 [1] : vector<128x128xf32> to vector<128xf32>
    %76 = vector.shape_cast %75 : vector<128xf32> to vector<128x1xf32>
    %cst_25 = arith.constant 1.000000e+00 : f32
    %77 = vector.broadcast %cst_25 : f32 to vector<128x1xf32>
    %78 = arith.mulf %76, %77 : vector<128x1xf32>
    %c0_26 = arith.constant 0 : index
    %c0_27 = arith.constant 0 : index
    %79 = vector.load %arg6[%c0_26, %c0_27] : memref<1x1xf32, #tpu.memory_space<vmem>>, vector<1x1xf32>
    %cst_28 = arith.constant 0.000000e+00 : f32
    %80 = vector.broadcast %cst_28 : f32 to vector<128x1xf32>
    %81 = arith.select %35, %78, %80 : vector<128x1xi1>, vector<128x1xf32>
    %82 = vector.shape_cast %81 : vector<128x1xf32> to vector<1x128x1xf32>
    %cst_29 = arith.constant dense<0.000000e+00> : vector<1xf32>
    %83 = vector.multi_reduction <add>, %82, %cst_29 [1, 2] : vector<1x128x1xf32> to vector<1xf32>
    %84 = vector.shape_cast %83 : vector<1xf32> to vector<1x1x1xf32>
    %85 = vector.extract %84[0, 0, 0] : f32 from vector<1x1x1xf32>
    %86 = vector.broadcast %85 : f32 to vector<1x1xf32>
    %87 = arith.addf %79, %86 : vector<1x1xf32>
    %c0_30 = arith.constant 0 : index
    %c0_31 = arith.constant 0 : index
    %88 = vector.load %arg6[%c0_30, %c0_31] : memref<1x1xf32, #tpu.memory_space<vmem>>, vector<1x1xf32>
    tpu.vector_store %arg6[%c0_30, %c0_31], %87 {strides = array<i32>} : memref<1x1xf32, #tpu.memory_space<vmem>>, vector<1x1xf32>,
    %cst_32 = arith.constant dense<0xFF800000> : vector<128xf32>
    %89 = vector.multi_reduction <maximumf>, %28, %cst_32 [0] : vector<128x128xf32> to vector<128xf32>
    %90 = vector.shape_cast %89 : vector<128xf32> to vector<1x128xf32>
    %c0_33 = arith.constant 0 : index
    %c0_34 = arith.constant 0 : index
    %91 = vector.load %arg3[%c0_33, %c0_34] : memref<1x128xf32, #tpu.memory_space<vmem>>, vector<1x128xf32>
    %92 = arith.maximumf %91, %90 : vector<1x128xf32>
    %c0_35 = arith.constant 0 : index
    %c0_36 = arith.constant 0 : index
    %93 = vector.load %arg4[%c0_35, %c0_36] : memref<1x128xf32, #tpu.memory_space<vmem>>, vector<1x128xf32>
    %c0_37 = arith.constant 0 : index
    %c0_38 = arith.constant 0 : index
    %94 = vector.load %arg3[%c0_37, %c0_38] : memref<1x128xf32, #tpu.memory_space<vmem>>, vector<1x128xf32>
    %95 = arith.subf %94, %92 : vector<1x128xf32>
    %96 = math.exp %95 : vector<1x128xf32>
    %97 = arith.mulf %93, %96 : vector<1x128xf32>
    %98 = vector.broadcast %92 : vector<1x128xf32> to vector<128x128xf32>
    %99 = arith.subf %28, %98 : vector<128x128xf32>
    %100 = math.exp %99 : vector<128x128xf32>
    %cst_39 = arith.constant dense<0.000000e+00> : vector<128xf32>
    %101 = vector.multi_reduction <add>, %100, %cst_39 [0] : vector<128x128xf32> to vector<128xf32>
    %102 = vector.shape_cast %101 : vector<128xf32> to vector<1x128xf32>
    %103 = arith.addf %97, %102 : vector<1x128xf32>
    %c0_40 = arith.constant 0 : index
    %c0_41 = arith.constant 0 : index
    %104 = vector.load %arg4[%c0_40, %c0_41] : memref<1x128xf32, #tpu.memory_space<vmem>>, vector<1x128xf32>
    tpu.vector_store %arg4[%c0_40, %c0_41], %103 {strides = array<i32>} : memref<1x128xf32, #tpu.memory_space<vmem>>, vector<1x128xf32>,
    %c0_42 = arith.constant 0 : index
    %c0_43 = arith.constant 0 : index
    %105 = vector.load %arg3[%c0_42, %c0_43] : memref<1x128xf32, #tpu.memory_space<vmem>>, vector<1x128xf32>
    tpu.vector_store %arg3[%c0_42, %c0_43], %92 {strides = array<i32>} : memref<1x128xf32, #tpu.memory_space<vmem>>, vector<1x128xf32>,
    %c0_i32_44 = arith.constant 0 : i32
    %106 = arith.cmpi eq, %arg0, %c0_i32_44 : i32
    %107 = arith.extui %106 : i1 to i32
    %c0_i32_45 = arith.constant 0 : i32
    %108 = arith.cmpi ne, %107, %c0_i32_45 : i32
    scf.if %108 {
      %c0_46 = arith.constant 0 : index
      %c0_47 = arith.constant 0 : index
      %109 = vector.load %arg3[%c0_46, %c0_47] : memref<1x128xf32, #tpu.memory_space<vmem>>, vector<1x128xf32>
      %c0_48 = arith.constant 0 : index
      %c0_49 = arith.constant 0 : index
      %110 = vector.load %arg4[%c0_48, %c0_49] : memref<1x128xf32, #tpu.memory_space<vmem>>, vector<1x128xf32>
      %111 = math.log %110 : vector<1x128xf32>
      %112 = arith.addf %109, %111 : vector<1x128xf32>
      %113 = tpu.iota {dimensions = array<i32: 1>} : vector<1x128xi32>
      %c8_i32_50 = arith.constant 8 : i32
      %114 = vector.broadcast %c8_i32_50 : i32 to vector<1x128xi32>
      %115 = arith.cmpi slt, %113, %114 : vector<1x128xi32>
      %cst_51 = arith.constant 0.000000e+00 : f32
      %116 = vector.broadcast %cst_51 : f32 to vector<1x128xf32>
      %117 = arith.select %115, %112, %116 : vector<1x128xi1>, vector<1x128xf32>
      %118 = vector.shape_cast %117 : vector<1x128xf32> to vector<1x1x128xf32>
      %cst_52 = arith.constant dense<0.000000e+00> : vector<1xf32>
      %119 = vector.multi_reduction <add>, %118, %cst_52 [1, 2] : vector<1x1x128xf32> to vector<1xf32>
      %120 = vector.shape_cast %119 : vector<1xf32> to vector<1x1x1xf32>
      %121 = vector.extract %120[0, 0, 0] : f32 from vector<1x1x1xf32>
      %122 = vector.broadcast %121 : f32 to vector<1x1xf32>
      %c0_53 = arith.constant 0 : index
      %c0_54 = arith.constant 0 : index
      %123 = vector.load %arg6[%c0_53, %c0_54] : memref<1x1xf32, #tpu.memory_space<vmem>>, vector<1x1xf32>
      %124 = arith.subf %122, %123 : vector<1x1xf32>
      %c0_55 = arith.constant 0 : index
      %c0_56 = arith.constant 0 : index
      %125 = vector.load %arg5[%c0_55, %c0_56] : memref<1x1xf32, #tpu.memory_space<vmem>>, vector<1x1xf32>
      %126 = arith.addf %125, %124 : vector<1x1xf32>
      %cst_57 = arith.constant 6.250000e-02 : f32
      %127 = vector.broadcast %cst_57 : f32 to vector<1x1xf32>
      %128 = arith.mulf %126, %127 : vector<1x1xf32>
      %c0_58 = arith.constant 0 : index
      %c0_59 = arith.constant 0 : index
      %129 = vector.load %arg2[%c0_58, %c0_59] : memref<1x1xf32, #tpu.memory_space<vmem>>, vector<1x1xf32>
      tpu.vector_store %arg2[%c0_58, %c0_59], %128 {strides = array<i32>} : memref<1x1xf32, #tpu.memory_space<vmem>>, vector<1x1xf32>,
    } else {
    }
    return
  }
  func.func @transform_0(%arg0: i32) -> (i32, i32) {
    %c0_i32 = arith.constant 0 : i32
    %c0_i32_0 = arith.constant 0 : i32
    %c0_i32_1 = arith.constant 0 : i32
    return %c0_i32, %c0_i32_0 : i32, i32
  }
  func.func @transform_1(%arg0: i32) -> (i32, i32) {
    %c0_i32 = arith.constant 0 : i32
    %c0_i32_0 = arith.constant 0 : i32
    %c0_i32_1 = arith.constant 0 : i32
    return %c0_i32, %c0_i32_0 : i32, i32
  }
}

</mosaic_0001>

<bundles_post_ra>
// kernel: tpu_custom_call.1
= control target key start
LH: loop header
LB: loop body
LE: loop exit
PB: predicated region body
PF: predicated region fallthrough
CT: control target
= control target key end

     0   :  { %6 = vsyncpa [#allocation7], 0  ;;  %s2274_s0 = inlined_call_operand.hbm [shape: bf16[128,256], index: 0, kind: input, shape index: {}]   ;;  %s2275_s1 = inlined_call_operand.hbm [shape: f32[1,1], index: 1, kind: output, shape index: {}]  }
   0x1   :  { %7 = vsyncpa [#allocation8], 0  ;;  %s1846_s6 = smov [#allocation6]   ;;  %s1798_s10 = scalar_lea.hbm %s2274_s0, 2048 }
   0x2   :  { %s13_s7 = sshll.u32 %s1846_s6, 4  ;;  %p1799_p0 = scmp.ne.s32.totalorder %s2274_s0, %s1798_s10  ;;  %s14_s7 = int_to_ptr.vmem [resolvable:$true] %s13_s7 }
   0x3   :  { %p1802_p1 = scmp.lt.u32.totalorder %s1798_s10, %s2274_s0 }
   0x5   :  { %p1804_p2 = pnand %p1802_p1, %p1799_p0 }
   0x7   :  { %1807 = shalt.err (!%p1804_p2)
}
   0x8   :  { %s1808_s15 = scalar_lea.vmem %s14_s7, 2048  ;;  %p1813_p4 = scmp.lt.s32.totalorder %s14_s7, %s14_s7 }
   0x9   :  { %p1809_p3 = scmp.ne.s32.totalorder %s14_s7, %s1808_s15  ;;  %p1814_p5 = scmp.lt.s32.totalorder %s1808_s15, %s1808_s15 }
   0xb   :  { %p1815_p6 = por %p1814_p5, %p1813_p4 }
   0xd   :  { %p1816_p7 = pnand %p1815_p6, %p1809_p3 }
   0xf   :  { %1819 = shalt.err (!%p1816_p7)
}
  0x10   :  { %s1847_s16 = smov 128   ;;  %s1848_s17 = smov 8  }
  0x11   :  { %19 = dma.hbm_to_vmem [thread:$0]  %s2274_s0, 2048, %s14_s7, [#allocation7], %s1847_s16, %s1847_s16, %s1848_s17  }
  0x12   :  { %1842 = dma.done.wait [#allocation7], 2048  }
  0x13   :  { %1843 = vsyncadd [#allocation7], 4294965248  ;;  %v1875_v0 = vld [vmem:[#allocation6] sm:$0xff]  ;;  %v35_v1 = vld [vmem:[#allocation6 + $0x8] sm:$0xff]  ;;  %v1849_v32 = vmov -1e+30   ;;  %v441_v33 = vlaneseq }
  0x14   :  { %v36_v2 = vld [vmem:[#allocation6 + $0x10] sm:$0xff]  ;;  %v1583_v3 = vcombine.high %v1875_v0, %v35_v1  ;;  %v1879_v4 = vcombine.low %v1875_v0, %v35_v1  ;;  %v37_v5 = vld [vmem:[#allocation6 + $0x18] sm:$0xff]  ;;  %v38_v7 = vld [vmem:[#allocation6 + $0x20] sm:$0xff]  ;;  %706 = vmax.xlane.f32.xlu1 %v1849_v32  ;;  %29 = vst [vmem:[#allocation2] sm:$0x1] %v1849_v32  ;;  %s1852_s22 = smov [#allocation9]  }
  0x15   :  { %v1881_v6 = vcombine.high %v36_v2, %v37_v5  ;;  %v39_v8 = vld [vmem:[#allocation6 + $0x28] sm:$0xff]  ;;  %v1887_v9 = vcombine.low %v36_v2, %v37_v5  ;;  %v40_v11 = vld [vmem:[#allocation6 + $0x30] sm:$0xff]  ;;  %v41_v12 = vld [vmem:[#allocation6 + $0x38] sm:$0xff]  ;;  %v1967_v34 = vand.u32 127, %v441_v33  ;;  %s1564_s23 = sshll.u32 %s1852_s22, 4  ;;  %s1565_s23 = int_to_ptr.vmem [resolvable:$true] %s1564_s23 }
  0x16   :  { %328 = vmatprep.subr.bf16.mxu1 %v1583_v3  ;;  %360 = vmatprep.mubr.bf16.mxu1 %v1583_v3  ;;  %v1889_v10 = vcombine.high %v38_v7, %v39_v8  ;;  %v1895_v13 = vcombine.low %v38_v7, %v39_v8  ;;  %v1897_v14 = vcombine.high %v40_v11, %v41_v12  ;;  %v42_v15 = vld [vmem:[#allocation6 + $0x40] sm:$0xff]  ;;  %v43_v16 = vld [vmem:[#allocation6 + $0x48] sm:$0xff]  ;;  %v44_v19 = vld [vmem:[#allocation6 + $0x50] sm:$0xff]  ;;  %s1820_s24 = scalar_lea.vmem %s1565_s23, 16  ;;  %s1824_s25 = scalar_lea.vmem %s1565_s23, 32 }
  0x17   :  { %329 = vmatpush1.bf16.xpose.msra.mxu1 %v1879_v4  ;;  %1686 = vmatprep.subr.bf16.mxu0 %v1583_v3  ;;  %v1903_v17 = vcombine.low %v40_v11, %v41_v12  ;;  %v1905_v18 = vcombine.high %v42_v15, %v43_v16  ;;  %v45_v20 = vld [vmem:[#allocation6 + $0x58] sm:$0xff]  ;;  %v1911_v21 = vcombine.low %v42_v15, %v43_v16  ;;  %v46_v23 = vld [vmem:[#allocation6 + $0x60] sm:$0xff]  ;;  %v47_v24 = vld [vmem:[#allocation6 + $0x68] sm:$0xff]  ;;  %vm493_vm0 = vcmp.lt.s32.totalorder %v1967_v34, 8  ;;  %p1821_p8 = scmp.ne.s32.totalorder %s1565_s23, %s1820_s24  ;;  %p1825_p9 = scmp.lt.s32.totalorder %s1565_s23, %s1565_s23 }
  0x18   :  { %330 = vmatprep.subr.bf16.mxu1 %v1881_v6  ;;  %1687 = vmatpush3.bf16.xpose.msra.mxu0 %v1583_v3  ;;  %v1913_v22 = vcombine.high %v44_v19, %v45_v20  ;;  %v1919_v25 = vcombine.low %v44_v19, %v45_v20  ;;  %v1921_v26 = vcombine.high %v46_v23, %v47_v24  ;;  %v48_v27 = vld [vmem:[#allocation6 + $0x70] sm:$0xff]  ;;  %v49_v28 = vld [vmem:[#allocation6 + $0x78] sm:$0xff]  ;;  %p1826_p10 = scmp.lt.s32.totalorder %s1824_s25, %s1820_s24 }
  0x19   :  { %1702 = vmatprep.mubr.bf16.mxu0 %v1879_v4  ;;  %1688 = vmatprep.subr.bf16.mxu0 %v1881_v6  ;;  %v1927_v29 = vcombine.low %v46_v23, %v47_v24  ;;  %v1929_v30 = vcombine.high %v48_v27, %v49_v28  ;;  %v1935_v31 = vcombine.low %v48_v27, %v49_v28 }
  0x1a   :  { %708 = vmax.xlane.f32.xlu1 %v1849_v32  ;;  %p1827_p11 = por %p1826_p10, %p1825_p9 }
  0x1c   :  { %p1828_p12 = pnand %p1827_p11, %p1821_p8 }
  0x1f   :  { %331 = vmatpush1.bf16.xpose.msra.mxu1 %v1887_v9 }
  0x20   :  { %332 = vmatprep.subr.bf16.mxu1 %v1889_v10  ;;  %1689 = vmatpush3.bf16.xpose.msra.mxu0 %v1881_v6 }
  0x21   :  { %1690 = vmatprep.subr.bf16.mxu0 %v1889_v10 }
  0x27   :  { %333 = vmatpush1.bf16.xpose.msra.mxu1 %v1895_v13 }
  0x28   :  { %334 = vmatprep.subr.bf16.mxu1 %v1897_v14  ;;  %1691 = vmatpush3.bf16.xpose.msra.mxu0 %v1889_v10 }
  0x29   :  { %1692 = vmatprep.subr.bf16.mxu0 %v1897_v14 }
  0x2f   :  { %335 = vmatpush1.bf16.xpose.msra.mxu1 %v1903_v17 }
  0x30   :  { %336 = vmatprep.subr.bf16.mxu1 %v1905_v18  ;;  %1693 = vmatpush3.bf16.xpose.msra.mxu0 %v1897_v14 }
  0x31   :  { %1694 = vmatprep.subr.bf16.mxu0 %v1905_v18 }
  0x37   :  { %337 = vmatpush1.bf16.xpose.msra.mxu1 %v1911_v21 }
  0x38   :  { %338 = vmatprep.subr.bf16.mxu1 %v1913_v22  ;;  %1695 = vmatpush3.bf16.xpose.msra.mxu0 %v1905_v18 }
  0x39   :  { %1696 = vmatprep.subr.bf16.mxu0 %v1913_v22 }
  0x3f   :  { %339 = vmatpush1.bf16.xpose.msra.mxu1 %v1919_v25 }
  0x40   :  { %340 = vmatprep.subr.bf16.mxu1 %v1921_v26  ;;  %1697 = vmatpush3.bf16.xpose.msra.mxu0 %v1913_v22 }
  0x41   :  { %1698 = vmatprep.subr.bf16.mxu0 %v1921_v26 }
  0x47   :  { %341 = vmatpush1.bf16.xpose.msra.mxu1 %v1927_v29 }
  0x48   :  { %342 = vmatprep.subr.bf16.mxu1 %v1929_v30  ;;  %1699 = vmatpush3.bf16.xpose.msra.mxu0 %v1921_v26 }
  0x49   :  { %1700 = vmatprep.subr.bf16.mxu0 %v1929_v30 }
  0x4f   :  { %343 = vmatpush1.bf16.xpose.msra.mxu1 %v1935_v31 }
  0x50   :  { %1701 = vmatpush3.bf16.xpose.msra.mxu0 %v1929_v30 }
  0x51   :  { %1718 = vmatprep.subr.bf16.mxu0 %v1879_v4 }
  0x56   :  { %361 = vmatmul.mubr.bf16.vlgmr.msra.gmra.mrb[0].mxu1 %v1879_v4 }
  0x57   :  { %1703 = vmatmul.mubr.bf16.vlgmr.msra.gmra.mrb[0].mxu0 %v1887_v9  ;;  %368 = vmatprep.mubr.bf16.mxu1 %v1881_v6 }
  0x58   :  { %1719 = vmatpush3.bf16.msra.mxu0 %v1879_v4  ;;  %1706 = vmatprep.mubr.bf16.mxu0 %v1895_v13 }
  0x59   :  { %1720 = vmatprep.subr.bf16.mxu0 %v1887_v9 }
  0x5c   :  { %1721 = vmatpush3.bf16.msra.mxu0 %v1887_v9 }
  0x5d   :  { %1722 = vmatprep.subr.bf16.mxu0 %v1895_v13 }
  0x5e   :  { %369 = vmatmul.mubr.bf16.gmra.mrb[4].mxu1 %v1887_v9 }
  0x5f   :  { %1707 = vmatmul.mubr.bf16.gmra.mrb[4].mxu0 %v1903_v17  ;;  %376 = vmatprep.mubr.bf16.mxu1 %v1889_v10 }
  0x60   :  { %1723 = vmatpush3.bf16.msra.mxu0 %v1895_v13  ;;  %1710 = vmatprep.mubr.bf16.mxu0 %v1911_v21 }
  0x61   :  { %1724 = vmatprep.subr.bf16.mxu0 %v1903_v17 }
  0x64   :  { %1725 = vmatpush3.bf16.msra.mxu0 %v1903_v17 }
  0x65   :  { %1726 = vmatprep.subr.bf16.mxu0 %v1911_v21 }
  0x66   :  { %377 = vmatmul.mubr.bf16.gmra.mrb[8].mxu1 %v1895_v13 }
  0x67   :  { %1711 = vmatmul.mubr.bf16.gmra.mrb[8].mxu0 %v1919_v25  ;;  %384 = vmatprep.mubr.bf16.mxu1 %v1897_v14 }
  0x68   :  { %1727 = vmatpush3.bf16.msra.mxu0 %v1911_v21  ;;  %1714 = vmatprep.mubr.bf16.mxu0 %v1927_v29 }
  0x69   :  { %1728 = vmatprep.subr.bf16.mxu0 %v1919_v25 }
  0x6c   :  { %1729 = vmatpush3.bf16.msra.mxu0 %v1919_v25 }
  0x6d   :  { %1730 = vmatprep.subr.bf16.mxu0 %v1927_v29 }
  0x6e   :  { %385 = vmatmul.mubr.bf16.gmra.mrb[12].mxu1 %v1903_v17 }
  0x6f   :  { %1715 = vmatmul.mubr.bf16.gmra.mrb[12].mxu0 %v1935_v31  ;;  %392 = vmatprep.mubr.bf16.mxu1 %v1905_v18 }
  0x70   :  { %1731 = vmatpush3.bf16.msra.mxu0 %v1927_v29 }
  0x71   :  { %1732 = vmatprep.subr.bf16.mxu0 %v1935_v31 }
  0x74   :  { %1733 = vmatpush3.bf16.msra.mxu0 %v1935_v31 }
  0x76   :  { %393 = vmatmul.mubr.bf16.gmra.mrb[16].mxu1 %v1911_v21 }
  0x77   :  { %400 = vmatprep.mubr.bf16.mxu1 %v1913_v22 }
  0x7e   :  { %401 = vmatmul.mubr.bf16.gmra.mrb[20].mxu1 %v1919_v25 }
  0x7f   :  { %408 = vmatprep.mubr.bf16.mxu1 %v1921_v26 }
  0x86   :  { %409 = vmatmul.mubr.bf16.gmra.mrb[24].mxu1 %v1927_v29 }
  0x87   :  { %416 = vmatprep.mubr.bf16.mxu1 %v1929_v30 }
  0x8e   :  { %417 = vmatmul.mubr.bf16.gmra.mrb[28].mxu1 %v1935_v31 }
  0xa1   :  { %v707_v42 = vpop.xlane.xlu1 %706 }
  0xa2   :  { %vm1608_vm1 = vcmp.eq.f32.partialorder %v707_v42, -1e+30  ;;  %v1455_v42 = vshrl.u32 %v441_v33, 7 }
  0xa3   :  { %v1974_v45 = vsel %vm1608_vm1, %v1967_v34, 128 }
  0xa4   :  { %v795_v48 = vshra.s32 %v1974_v45, 16 }
  0xa6   :  { %v1982_v53 = vcvt.s32.f32 %v795_v48 }
  0xa7   :  { %v709_v43 = vpop.xlane.xlu1 %708 }
  0xa8   :  { %vm1609_vm3 = vcmp.eq.f32.partialorder %v709_v43, -1e+30  ;;  %v1456_v43 = vsub.s32 0, %v1455_v42 }
  0xa9   :  { %v1979_v50 = vsel %vm1609_vm3, %v1967_v34, 128 }
  0xaa   :  { %v809_v55 = vshra.s32 %v1979_v50, 16 }
  0xac   :  { %v1986_v57 = vcvt.s32.f32 %v809_v55 }
 0x129   :  { %v362_v35 = vpop.f32.mrb[0].mxu1 }
 0x12a   :  { %v425_v36 = vmul.f32 0.5, %v362_v35  ;;  %v364_v37 = vpop.f32.mrb[1].mxu1  ;;  %v1704_v39 = vpop.f32.mrb[0].mxu0 }
 0x12b   :  { %v365_v38 = vpop.f32.mrb[2].mxu1  ;;  %v201_v58 = vpop.f32.mrb[1].mxu0 }
 0x12c   :  { %v367_v40 = vpop.f32.mrb[3].mxu1  ;;  %v526_v41 = vsel %vm493_vm0, %v425_v36, -1e+30  ;;  %v1991_v59 = vsel %vm493_vm0, %v201_v58, -1e+30  ;;  %v1705_v60 = vpop.f32.mrb[2].mxu0 }
 0x12d   :  { %702 = vmax.xlane.f32.xlu0 %v526_v41  ;;  %v1425_v61 = vmax.f32 %v1991_v59, -1e+30  ;;  %v204_v62 = vpop.f32.mrb[3].mxu0  ;;  %v1994_v38 = vld [vmem:[#allocation2] sm:$0x1]  ;;  %v794_v58 = vand.u32 65535, %v1974_v45 }
 0x12f   :  { %v1429_v1 = vmax.f32 %v1425_v61, -1e+30 }
 0x131   :  { %704 = vmax.xlane.f32.xlu0 %v1849_v32  ;;  %v1433_v4 = vmax.f32 %v1429_v1, -1e+30 }
 0x132   :  { %v1708_v63 = vpop.f32.mrb[4].mxu0 }
 0x133   :  { %v217_v2 = vpop.f32.mrb[5].mxu0  ;;  %v1437_v8 = vmax.f32 %v1433_v4, -1e+30  ;;  %v808_v63 = vand.u32 65535, %v1979_v50 }
 0x134   :  { %v1709_v3 = vpop.f32.mrb[6].mxu0 }
 0x135   :  { %v220_v5 = vpop.f32.mrb[7].mxu0  ;;  %v1439_v15 = vmax.f32 %v1437_v8, -1e+30 }
 0x136   :  { %v810_v5 = vcvt.s32.f32 %v808_v63 }
 0x137   :  { %v1440_v20 = vrot.slane %v1439_v15, 4 }
 0x139   :  { %v1441_v27 = vmax.f32 %v1439_v15, %v1440_v20 }
 0x13a   :  { %v1712_v7 = vpop.f32.mrb[8].mxu0 }
 0x13b   :  { %v233_v11 = vpop.f32.mrb[9].mxu0  ;;  %v1442_v35 = vrot.slane %v1441_v27, 2 }
 0x13c   :  { %v1713_v12 = vpop.f32.mrb[10].mxu0  ;;  %v1850_v11 = vmov 0.0  }
 0x13d   :  { %v236_v16 = vpop.f32.mrb[11].mxu0  ;;  %v1443_v36 = vmax.f32 %v1441_v27, %v1442_v35  ;;  %30 = vst [vmem:[#allocation3] sm:$0x1] %v1850_v11 }
 0x13f   :  { %v1444_v37 = vrot.slane %v1443_v36, 1 }
 0x141   :  { %v1445_v39 = vmax.f32 %v1443_v36, %v1444_v37 }
 0x142   :  { %v1716_v19 = vpop.f32.mrb[12].mxu0 }
 0x143   :  { %v249_v23 = vpop.f32.mrb[13].mxu0  ;;  %v1997_v40 = vmax.f32 %v1994_v38, %v1445_v39 }
 0x144   :  { %v1717_v24 = vpop.f32.mrb[14].mxu0 }
 0x145   :  { %v252_v28 = vpop.f32.mrb[15].mxu0  ;;  %1530 = vst [vmem:[#allocation2] sm:$0x1] %v1997_v40 }
 0x1ba   :  { %v703_v44 = vpop.xlane.xlu0 %702 }
 0x1bb   :  { %vm734_vm2 = vcmp.eq.f32.partialorder %v526_v41, %v703_v44  ;;  %v1449_v41 = vsub.f32 %v1994_v38, %v1997_v40  ;;  %v1457_v44 = vrot.slane %v1997_v40, %v1456_v43 }
 0x1bc   :  { %v750_v46 = vsel %vm734_vm2, %v1967_v34, 128 }
 0x1bd   :  { %v767_v47 = vshra.s32 %v750_v46, 16  ;;  %v1460_v48 = vsub.f32 -1e+30, %v1457_v44  ;;  %v766_v55 = vand.u32 65535, %v750_v46  ;;  %v796_v46 = vcvt.s32.f32 %v794_v58 }
 0x1be   :  { %v705_v49 = vpop.xlane.xlu0 %704  ;;  %v1450_v28 = vmul.f32 1.442695, %v1449_v41 }
 0x1bf   :  { %vm1607_vm4 = vcmp.eq.f32.partialorder %v705_v49, -1e+30  ;;  %v769_v51 = vcvt.s32.f32 %v767_v47  ;;  %v1459_v47 = vsub.f32 %v1991_v59, %v1457_v44  ;;  %v768_v62 = vcvt.s32.f32 %v766_v55 }
 0x1c0   :  { %v751_v52 = vsel %vm1607_vm4, %v1967_v34, 128 }
 0x1c1   :  { %770 = vmin.xlane.f32.xlu0 %v769_v51  ;;  %v781_v54 = vshra.s32 %v751_v52, 16  ;;  %v1475_v49 = vmul.f32 1.442695, %v1459_v47  ;;  %v780_v60 = vand.u32 65535, %v751_v52 }
 0x1c3   :  { %v783_v56 = vcvt.s32.f32 %v781_v54  ;;  %v1477_v54 = vmul.f32 1.442695, %v1460_v48  ;;  %1786 = vpow2.f32 %v1475_v49  ;;  %v782_v3 = vcvt.s32.f32 %v780_v60  ;;  %v1448_v48 = vld [vmem:[#allocation3] sm:$0x1] }
 0x1c5   :  { %798 = vmin.xlane.f32.xlu0 %v1982_v53  ;;  %784 = vmin.xlane.f32.xlu1 %v783_v56  ;;  %1788 = vpow2.f32 %v1477_v54 }
 0x1c6   :  { %1790 = vpow2.f32 %v1450_v28 }
 0x1c9   :  { %812 = vmin.xlane.f32.xlu1 %v1986_v57 }
 0x24e   :  { %v2006_v61 = vpop.xlane.xlu0 %770 }
 0x24f   :  { %vm772_vm5 = vcmp.eq.f32.partialorder %v769_v51, %v2006_v61  ;;  %v1787_v51 = vpop.eup %1786  ;;  %v777_v58 = vcvt.f32.s32 %v2006_v61 }
 0x250   :  { %v773_v33 = vsel %vm772_vm5, %v768_v62, inf  ;;  %v1789_v50 = vpop.eup %1788 }
 0x251   :  { %774 = vmin.xlane.f32.xlu0 %v773_v33  ;;  %v1791_v47 = vpop.eup %1790  ;;  %v778_v62 = vshll.u32 %v777_v58, 16 }
 0x252   :  { %v2010_v1 = vpop.xlane.xlu1 %784  ;;  %v2012_v2 = vpop.xlane.xlu0 %798  ;;  %v1452_v49 = vmul.f32 %v1791_v47, %v1448_v48 }
 0x253   :  { %vm786_vm6 = vcmp.eq.f32.partialorder %v783_v56, %v2010_v1  ;;  %vm800_vm7 = vcmp.eq.f32.partialorder %v1982_v53, %v2012_v2  ;;  %v1507_v56 = vadd.f32 %v1789_v50, %v1787_v51  ;;  %v791_v38 = vcvt.f32.s32 %v2010_v1 }
 0x254   :  { %v787_v45 = vsel %vm786_vm6, %v782_v3, inf  ;;  %v801_v52 = vsel %vm800_vm7, %v796_v46, inf  ;;  %v805_v41 = vcvt.f32.s32 %v2012_v2 }
 0x255   :  { %788 = vmin.xlane.f32.xlu1 %v787_v45  ;;  %802 = vmin.xlane.f32.xlu0 %v801_v52  ;;  %v1508_v53 = vadd.f32 %v1789_v50, %v1507_v56  ;;  %v792_v46 = vshll.u32 %v791_v38, 16 }
 0x256   :  { %v2017_v4 = vpop.xlane.xlu1 %812 }
 0x257   :  { %vm814_vm8 = vcmp.eq.f32.partialorder %v1986_v57, %v2017_v4  ;;  %v1509_v8 = vadd.f32 %v1789_v50, %v1508_v53  ;;  %v819_v33 = vcvt.f32.s32 %v2017_v4 }
 0x258   :  { %v815_v7 = vsel %vm814_vm8, %v810_v5, inf  ;;  %v806_v5 = vshll.u32 %v805_v41, 16 }
 0x259   :  { %816 = vmin.xlane.f32.xlu1 %v815_v7  ;;  %710 = vmax.xlane.f32.xlu0 %v1849_v32  ;;  %v1510_v57 = vadd.f32 %v1789_v50, %v1509_v8  ;;  %v820_v7 = vshll.u32 %v819_v33, 16  ;;  %v1851_v8 = vmov 1.0|1.0  }
 0x25b   :  { %v1511_v12 = vadd.f32 %v1789_v50, %v1510_v57 }
 0x25d   :  { %712 = vmax.xlane.f32.xlu1 %v1849_v32  ;;  %714 = vmax.xlane.f32.xlu0 %v1849_v32  ;;  %v1512_v15 = vadd.f32 %v1789_v50, %v1511_v12 }
 0x25f   :  { %v1513_v16 = vadd.f32 %v1789_v50, %v1512_v15 }
 0x261   :  { %716 = vmax.xlane.f32.xlu1 %v1849_v32  ;;  %718 = vmax.xlane.f32.xlu0 %v1849_v32  ;;  %v1514_v19 = vadd.f32 %v1789_v50, %v1513_v16 }
 0x263   :  { %v1515_v20 = vadd.f32 %v1789_v50, %v1514_v19 }
 0x265   :  { %720 = vmax.xlane.f32.xlu1 %v1849_v32  ;;  %722 = vmax.xlane.f32.xlu0 %v1849_v32  ;;  %v1516_v23 = vadd.f32 %v1789_v50, %v1515_v20 }
 0x267   :  { %v1517_v24 = vadd.f32 %v1789_v50, %v1516_v23 }
 0x269   :  { %724 = vmax.xlane.f32.xlu1 %v1849_v32  ;;  %726 = vmax.xlane.f32.xlu0 %v1849_v32  ;;  %v1518_v27 = vadd.f32 %v1789_v50, %v1517_v24 }
 0x26b   :  { %v1519_v35 = vadd.f32 %v1789_v50, %v1518_v27 }
 0x26d   :  { %728 = vmax.xlane.f32.xlu1 %v1849_v32  ;;  %730 = vmax.xlane.f32.xlu0 %v1849_v32  ;;  %v1520_v36 = vadd.f32 %v1789_v50, %v1519_v35 }
 0x26f   :  { %v1521_v37 = vadd.f32 %v1789_v50, %v1520_v36 }
 0x271   :  { %732 = vmax.xlane.f32.xlu1 %v1849_v32  ;;  %v1522_v39 = vrot.slane %v1521_v37, 4 }
 0x273   :  { %v1523_v42 = vadd.f32 %v1522_v39, %v1521_v37 }
 0x275   :  { %v1524_v43 = vrot.slane %v1523_v42, 2 }
 0x277   :  { %v1525_v44 = vadd.f32 %v1524_v43, %v1523_v42 }
 0x279   :  { %v1526_v32 = vrot.slane %v1525_v44, 1 }
 0x27b   :  { %v1527_v54 = vadd.f32 %v1526_v32, %v1525_v44 }
 0x27d   :  { %v1528_v55 = vadd.f32 %v1527_v54, %v1452_v49 }
 0x27f   :  { %1529 = vst [vmem:[#allocation3] sm:$0x1] %v1528_v55 }
 0x2de   :  { %v775_v60 = vpop.xlane.xlu0 %774 }
 0x2df   :  { %v776_v40 = vcvt.f32.s32 %v775_v60 }
 0x2e1   :  { %v2041_v45 = vadd.s32 %v778_v62, %v776_v40 }
 0x2e2   :  { %v789_v63 = vpop.xlane.xlu1 %788  ;;  %v803_v3 = vpop.xlane.xlu0 %802 }
 0x2e3   :  { %v790_v52 = vcvt.f32.s32 %v789_v63  ;;  %v804_v51 = vcvt.f32.s32 %v803_v3  ;;  %vm990_vm10 = vcmp.eq.s32.totalorder %v1967_v34, %v2041_v45  ;;  %v1269_v45 = vrot.slane %v1875_v0, 4 }
 0x2e5   :  { %v793_v50 = vadd.s32 %v792_v46, %v790_v52  ;;  %v807_v61 = vadd.s32 %v806_v5, %v804_v51 }
 0x2e6   :  { %v817_v56 = vpop.xlane.xlu1 %816  ;;  %v711_v53 = vpop.xlane.xlu0 %710 }
 0x2e7   :  { %v818_v1 = vcvt.f32.s32 %v817_v56  ;;  %vm1610_vm9 = vcmp.eq.f32.partialorder %v711_v53, -1e+30  ;;  %vm991_vm11 = vcmp.eq.s32.totalorder %v1967_v34, %v793_v50  ;;  %vm992_vm13 = vcmp.eq.s32.totalorder %v1967_v34, %v807_v61 }
 0x2e8   :  { %v2047_v2 = vsel %vm1610_vm9, %v1967_v34, 128  ;;  %vm1638_vm12 = vmpackc.low %vm991_vm11, %vm990_vm10 }
 0x2e9   :  { %v821_v4 = vadd.s32 %v820_v7, %v818_v1  ;;  %1734 = vmatprep.mubr.msk.bf16.mxu0 %vm1638_vm12, %v1851_v8  ;;  %v823_v57 = vshra.s32 %v2047_v2, 16 }
 0x2ea   :  { %v713_v12 = vpop.xlane.xlu1 %712  ;;  %v715_v15 = vpop.xlane.xlu0 %714 }
 0x2eb   :  { %vm993_vm14 = vcmp.eq.s32.totalorder %v1967_v34, %v821_v4  ;;  %vm1611_vm15 = vcmp.eq.f32.partialorder %v713_v12, -1e+30  ;;  %vm1612_vm1 = vcmp.eq.f32.partialorder %v715_v15, -1e+30  ;;  %v2056_v16 = vcvt.s32.f32 %v823_v57 }
 0x2ec   :  { %vm1640_vm2 = vmpackc.low %vm993_vm14, %vm992_vm13  ;;  %v2059_v19 = vsel %vm1611_vm15, %v1967_v34, 128  ;;  %v2062_v20 = vsel %vm1612_vm1, %v1967_v34, 128 }
 0x2ed   :  { %826 = vmin.xlane.f32.xlu0 %v2056_v16  ;;  %1735 = vmatmul.mubr.msk.bf16.vlgmr.msra.gmra.mrb[16].mxu0 %vm1640_vm2, %v1851_v8  ;;  %v837_v23 = vshra.s32 %v2059_v19, 16  ;;  %v851_v24 = vshra.s32 %v2062_v20, 16 }
 0x2ee   :  { %v717_v27 = vpop.xlane.xlu1 %716  ;;  %v719_v28 = vpop.xlane.xlu0 %718 }
 0x2ef   :  { %vm1613_vm3 = vcmp.eq.f32.partialorder %v717_v27, -1e+30  ;;  %vm1614_vm4 = vcmp.eq.f32.partialorder %v719_v28, -1e+30  ;;  %v2068_v35 = vcvt.s32.f32 %v837_v23  ;;  %v2070_v36 = vcvt.s32.f32 %v851_v24 }
 0x2f0   :  { %v2073_v37 = vsel %vm1613_vm3, %v1967_v34, 128  ;;  %v2076_v39 = vsel %vm1614_vm4, %v1967_v34, 128  ;;  %v822_v23 = vand.u32 65535, %v2047_v2  ;;  %v836_v24 = vand.u32 65535, %v2059_v19 }
 0x2f1   :  { %840 = vmin.xlane.f32.xlu1 %v2068_v35  ;;  %854 = vmin.xlane.f32.xlu0 %v2070_v36  ;;  %v865_v42 = vshra.s32 %v2073_v37, 16  ;;  %v879_v43 = vshra.s32 %v2076_v39, 16  ;;  %v850_v27 = vand.u32 65535, %v2062_v20 }
 0x2f2   :  { %v721_v44 = vpop.xlane.xlu1 %720  ;;  %v723_v47 = vpop.xlane.xlu0 %722  ;;  %v838_v19 = vcvt.s32.f32 %v836_v24 }
 0x2f3   :  { %vm1615_vm5 = vcmp.eq.f32.partialorder %v721_v44, -1e+30  ;;  %vm1616_vm6 = vcmp.eq.f32.partialorder %v723_v47, -1e+30  ;;  %v2082_v32 = vcvt.s32.f32 %v865_v42  ;;  %v2084_v48 = vcvt.s32.f32 %v879_v43 }
 0x2f4   :  { %v2087_v49 = vsel %vm1615_vm5, %v1967_v34, 128  ;;  %v2090_v54 = vsel %vm1616_vm6, %v1967_v34, 128  ;;  %v824_v42 = vcvt.s32.f32 %v822_v23  ;;  %v864_v44 = vand.u32 65535, %v2073_v37 }
 0x2f5   :  { %868 = vmin.xlane.f32.xlu1 %v2082_v32  ;;  %882 = vmin.xlane.f32.xlu0 %v2084_v48  ;;  %v893_v55 = vshra.s32 %v2087_v49, 16  ;;  %v907_v58 = vshra.s32 %v2090_v54, 16  ;;  %v878_v47 = vand.u32 65535, %v2076_v39  ;;  %v852_v2 = vcvt.s32.f32 %v850_v27 }
 0x2f6   :  { %v725_v60 = vpop.xlane.xlu1 %724  ;;  %v727_v38 = vpop.xlane.xlu0 %726  ;;  %v892_v37 = vand.u32 65535, %v2087_v49  ;;  %v906_v39 = vand.u32 65535, %v2090_v54 }
 0x2f7   :  { %vm1617_vm7 = vcmp.eq.f32.partialorder %v725_v60, -1e+30  ;;  %vm1618_vm8 = vcmp.eq.f32.partialorder %v727_v38, -1e+30  ;;  %v2096_v40 = vcvt.s32.f32 %v893_v55  ;;  %v2098_v41 = vcvt.s32.f32 %v907_v58 }
 0x2f8   :  { %v2101_v62 = vsel %vm1617_vm7, %v1967_v34, 128  ;;  %v2104_v33 = vsel %vm1618_vm8, %v1967_v34, 128 }
 0x2f9   :  { %896 = vmin.xlane.f32.xlu1 %v2096_v40  ;;  %910 = vmin.xlane.f32.xlu0 %v2098_v41  ;;  %v921_v63 = vshra.s32 %v2101_v62, 16  ;;  %v935_v3 = vshra.s32 %v2104_v33, 16  ;;  %v920_v49 = vand.u32 65535, %v2101_v62  ;;  %v934_v54 = vand.u32 65535, %v2104_v33 }
 0x2fa   :  { %v729_v46 = vpop.xlane.xlu1 %728  ;;  %v731_v52 = vpop.xlane.xlu0 %730 }
 0x2fb   :  { %vm1619_vm9 = vcmp.eq.f32.partialorder %v729_v46, -1e+30  ;;  %vm1620_vm11 = vcmp.eq.f32.partialorder %v731_v52, -1e+30  ;;  %v2110_v51 = vcvt.s32.f32 %v921_v63  ;;  %v2112_v5 = vcvt.s32.f32 %v935_v3 }
 0x2fc   :  { %v2115_v50 = vsel %vm1619_vm9, %v1967_v34, 128  ;;  %v2118_v7 = vsel %vm1620_vm11, %v1967_v34, 128  ;;  %v880_v63 = vcvt.s32.f32 %v878_v47  ;;  %v866_v3 = vcvt.s32.f32 %v864_v44 }
 0x2fd   :  { %924 = vmin.xlane.f32.xlu1 %v2110_v51  ;;  %938 = vmin.xlane.f32.xlu0 %v2112_v5  ;;  %v949_v61 = vshra.s32 %v2115_v50, 16  ;;  %v963_v56 = vshra.s32 %v2118_v7, 16  ;;  %v948_v62 = vand.u32 65535, %v2115_v50  ;;  %v962_v33 = vand.u32 65535, %v2118_v7 }
 0x2fe   :  { %v733_v53 = vpop.xlane.xlu1 %732  ;;  %v936_v23 = vcvt.s32.f32 %v934_v54  ;;  %v922_v24 = vcvt.s32.f32 %v920_v49 }
 0x2ff   :  { %vm1621_vm12 = vcmp.eq.f32.partialorder %v733_v53, -1e+30  ;;  %v2124_v1 = vcvt.s32.f32 %v949_v61  ;;  %v2126_v4 = vcvt.s32.f32 %v963_v56  ;;  %v908_v61 = vcvt.s32.f32 %v906_v39 }
 0x300   :  { %v2129_v57 = vsel %vm1621_vm12, %v1967_v34, 128  ;;  %v894_v56 = vcvt.s32.f32 %v892_v37 }
 0x301   :  { %952 = vmin.xlane.f32.xlu1 %v2124_v1  ;;  %966 = vmin.xlane.f32.xlu0 %v2126_v4  ;;  %v977_v12 = vshra.s32 %v2129_v57, 16  ;;  %v976_v50 = vand.u32 65535, %v2129_v57 }
 0x303   :  { %v2134_v15 = vcvt.s32.f32 %v977_v12  ;;  %v978_v57 = vcvt.s32.f32 %v976_v50 }
 0x305   :  { %980 = vmin.xlane.f32.xlu1 %v2134_v15  ;;  %542 = vmax.xlane.f32.xlu0 %v1991_v59 }
 0x37a   :  { %v2141_v28 = vpop.xlane.xlu0 %826 }
 0x37b   :  { %vm828_vm13 = vcmp.eq.f32.partialorder %v2056_v16, %v2141_v28  ;;  %v833_v0 = vcvt.f32.s32 %v2141_v28 }
 0x37c   :  { %v829_v43 = vsel %vm828_vm13, %v824_v42, inf  ;;  %v964_v42 = vcvt.s32.f32 %v962_v33 }
 0x37d   :  { %830 = vmin.xlane.f32.xlu1 %v829_v43  ;;  %v950_v43 = vcvt.s32.f32 %v948_v62  ;;  %v834_v18 = vshll.u32 %v833_v0, 16  ;;  %v1535_v0 = vld [vmem:[#allocation3] sm:$0x1] }
 0x37e   :  { %v2147_v55 = vpop.xlane.xlu1 %840  ;;  %v2149_v58 = vpop.xlane.xlu0 %854 }
 0x37f   :  { %vm856_vm14 = vcmp.eq.f32.partialorder %v2070_v36, %v2149_v58  ;;  %vm842_vm15 = vcmp.eq.f32.partialorder %v2068_v35, %v2147_v55  ;;  %v847_v13 = vcvt.f32.s32 %v2147_v55  ;;  %v861_v17 = vcvt.f32.s32 %v2149_v58 }
 0x380   :  { %v857_v20 = vsel %vm856_vm14, %v852_v2, inf  ;;  %v843_v16 = vsel %vm842_vm15, %v838_v19, inf }
 0x381   :  { %858 = vmin.xlane.f32.xlu1 %v857_v20  ;;  %844 = vmin.xlane.f32.xlu0 %v843_v16  ;;  %v848_v26 = vshll.u32 %v847_v13, 16  ;;  %v862_v30 = vshll.u32 %v861_v17, 16 }
 0x382   :  { %v2157_v60 = vpop.xlane.xlu1 %868  ;;  %v2159_v38 = vpop.xlane.xlu0 %882 }
 0x383   :  { %vm884_vm1 = vcmp.eq.f32.partialorder %v2084_v48, %v2159_v38  ;;  %vm870_vm2 = vcmp.eq.f32.partialorder %v2082_v32, %v2157_v60  ;;  %v875_v21 = vcvt.f32.s32 %v2157_v60  ;;  %v889_v31 = vcvt.f32.s32 %v2159_v38 }
 0x384   :  { %v885_v35 = vsel %vm884_vm1, %v880_v63, inf  ;;  %v871_v36 = vsel %vm870_vm2, %v866_v3, inf }
 0x385   :  { %886 = vmin.xlane.f32.xlu1 %v885_v35  ;;  %872 = vmin.xlane.f32.xlu0 %v871_v36  ;;  %v876_v28 = vshll.u32 %v875_v21, 16  ;;  %v1534_v21 = vld [vmem:[#allocation2] sm:$0x1] }
 0x386   :  { %v2167_v46 = vpop.xlane.xlu1 %896  ;;  %v2169_v52 = vpop.xlane.xlu0 %910 }
 0x387   :  { %vm912_vm3 = vcmp.eq.f32.partialorder %v2098_v41, %v2169_v52  ;;  %vm898_vm4 = vcmp.eq.f32.partialorder %v2096_v40, %v2167_v46  ;;  %v903_v36 = vcvt.f32.s32 %v2167_v46  ;;  %v917_v60 = vcvt.f32.s32 %v2169_v52 }
 0x388   :  { %v913_v32 = vsel %vm912_vm3, %v908_v61, inf  ;;  %v899_v48 = vsel %vm898_vm4, %v894_v56, inf  ;;  %v890_v56 = vshll.u32 %v889_v31, 16 }
 0x389   :  { %914 = vmin.xlane.f32.xlu1 %v913_v32  ;;  %900 = vmin.xlane.f32.xlu0 %v899_v48  ;;  %v904_v38 = vshll.u32 %v903_v36, 16 }
 0x38a   :  { %v2177_v53 = vpop.xlane.xlu1 %924  ;;  %v2179_v12 = vpop.xlane.xlu0 %938 }
 0x38b   :  { %vm940_vm5 = vcmp.eq.f32.partialorder %v2112_v5, %v2179_v12  ;;  %vm926_vm6 = vcmp.eq.f32.partialorder %v2110_v51, %v2177_v53  ;;  %v931_v48 = vcvt.f32.s32 %v2177_v53  ;;  %v945_v52 = vcvt.f32.s32 %v2179_v12 }
 0x38c   :  { %v941_v40 = vsel %vm940_vm5, %v936_v23, inf  ;;  %v927_v41 = vsel %vm926_vm6, %v922_v24, inf }
 0x38d   :  { %942 = vmin.xlane.f32.xlu1 %v941_v40  ;;  %928 = vmin.xlane.f32.xlu0 %v927_v41  ;;  %v918_v40 = vshll.u32 %v917_v60, 16  ;;  %v932_v50 = vshll.u32 %v931_v48, 16 }
 0x38e   :  { %v2186_v27 = vpop.xlane.xlu1 %952  ;;  %v2188_v7 = vpop.xlane.xlu0 %966 }
 0x38f   :  { %vm968_vm7 = vcmp.eq.f32.partialorder %v2126_v4, %v2188_v7  ;;  %vm954_vm8 = vcmp.eq.f32.partialorder %v2124_v1, %v2186_v27  ;;  %v1622_v1 = vsel %vm990_vm10, 1.0, %v1850_v11 }
 0x390   :  { %v969_v5 = vsel %vm968_vm7, %v964_v42, inf  ;;  %v955_v51 = vsel %vm954_vm8, %v950_v43, inf  ;;  %v1038_v20 = vmul.f32 %v1622_v1, %v1991_v59  ;;  %v959_v42 = vcvt.f32.s32 %v2186_v27 }
 0x391   :  { %970 = vmin.xlane.f32.xlu1 %v969_v5  ;;  %956 = vmin.xlane.f32.xlu0 %v955_v51 }
 0x392   :  { %v2194_v44 = vpop.xlane.xlu1 %980  ;;  %v2196_v47 = vpop.xlane.xlu0 %542  ;;  %v960_v1 = vshll.u32 %v959_v42, 16 }
 0x393   :  { %v574_v2 = vsub.f32 %v1991_v59, %v2196_v47  ;;  %vm982_vm9 = vcmp.eq.f32.partialorder %v2134_v15, %v2194_v44  ;;  %v1301_v59 = vunpack.c.l.bf16 %v1269_v45 }
 0x394   :  { %v983_v19 = vsel %vm982_vm9, %v978_v57, inf }
 0x395   :  { %v590_v4 = vmul.f32 1.442695, %v574_v2  ;;  %984 = vmin.xlane.f32.xlu0 %v983_v19  ;;  %v946_v2 = vshll.u32 %v945_v52, 16  ;;  %v973_v19 = vcvt.f32.s32 %v2188_v7 }
 0x397   :  { %1792 = vpow2.f32 %v590_v4  ;;  %v987_v4 = vcvt.f32.s32 %v2194_v44 }
 0x398   :  { %1794 = vlog2.f32 %v1535_v0 }
 0x399   :  { %1054 = vadd.xlane.f32.xlu0 %v1038_v20  ;;  %v988_v7 = vshll.u32 %v987_v4, 16 }
 0x3a1   :  { %v1793_v16 = vpop.eup %1792 }
 0x3a2   :  { %622 = vadd.xlane.f32.xlu1 %v1793_v16  ;;  %v1795_v13 = vpop.eup %1794 }
 0x3a3   :  { %v1537_v17 = vmul.f32 0.6931472, %v1795_v13 }
 0x3c0   :  { %v1736_v15 = vpop.f32.mrb[16].mxu0 }
 0x3c1   :  { %v1206_v37 = vpop.f32.mrb[17].mxu0  ;;  %v974_v15 = vshll.u32 %v973_v19, 16 }
 0x3c2   :  { %v1317_v6 = vmul.f32 %v1301_v59, %v1206_v37  ;;  %v1737_v39 = vpop.f32.mrb[18].mxu0 }
 0x3c3   :  { %v1209_v9 = vpop.f32.mrb[19].mxu0 }
 0x3c4   :  { %1333 = vadd.xlane.f32.xlu1 %v1317_v6 }
 0x40a   :  { %v831_v10 = vpop.xlane.xlu1 %830 }
 0x40b   :  { %v832_v14 = vcvt.f32.s32 %v831_v10 }
 0x40d   :  { %v835_v63 = vadd.s32 %v834_v18, %v832_v14 }
 0x40e   :  { %v859_v22 = vpop.xlane.xlu1 %858  ;;  %v845_v25 = vpop.xlane.xlu0 %844 }
 0x40f   :  { %v860_v29 = vcvt.f32.s32 %v859_v22  ;;  %v846_v3 = vcvt.f32.s32 %v845_v25  ;;  %vm994_vm10 = vcmp.eq.s32.totalorder %v1967_v34, %v835_v63 }
 0x411   :  { %v849_v35 = vadd.s32 %v848_v26, %v846_v3  ;;  %v863_v55 = vadd.s32 %v862_v30, %v860_v29  ;;  %v1538_v26 = vadd.f32 %v1537_v17, %v1534_v21 }
 0x412   :  { %v887_v49 = vpop.xlane.xlu1 %886  ;;  %v873_v54 = vpop.xlane.xlu0 %872 }
 0x413   :  { %v888_v58 = vcvt.f32.s32 %v887_v49  ;;  %v874_v61 = vcvt.f32.s32 %v873_v54  ;;  %vm995_vm11 = vcmp.eq.s32.totalorder %v1967_v34, %v849_v35  ;;  %vm996_vm13 = vcmp.eq.s32.totalorder %v1967_v34, %v863_v55  ;;  %v370_v35 = vpop.f32.mrb[4].mxu1 }
 0x414   :  { %vm1642_vm12 = vmpackc.low %vm995_vm11, %vm994_vm10 }
 0x415   :  { %v877_v32 = vadd.s32 %v876_v28, %v874_v61  ;;  %1738 = vmatprep.mubr.msk.bf16.mxu0 %vm1642_vm12, %v1851_v8  ;;  %v891_v33 = vadd.s32 %v890_v56, %v888_v58  ;;  %v372_v28 = vpop.f32.mrb[5].mxu1 }
 0x416   :  { %v915_v46 = vpop.xlane.xlu1 %914  ;;  %v901_v62 = vpop.xlane.xlu0 %900 }
 0x417   :  { %v916_v23 = vcvt.f32.s32 %v915_v46  ;;  %v902_v24 = vcvt.f32.s32 %v901_v62  ;;  %vm997_vm14 = vcmp.eq.s32.totalorder %v1967_v34, %v877_v32  ;;  %vm998_vm1 = vcmp.eq.s32.totalorder %v1967_v34, %v891_v33  ;;  %v373_v36 = vpop.f32.mrb[6].mxu1 }
 0x418   :  { %vm1644_vm15 = vmpackc.low %vm997_vm14, %vm996_vm13  ;;  %vm1119_vm13 = vcmask 7168   ;;  %vm1540_vm14 = vcmask 1040384   ;;  %v375_v55 = vpop.f32.mrb[7].mxu1 }
 0x419   :  { %v905_v41 = vadd.s32 %v904_v38, %v902_v24  ;;  %1739 = vmatmul.mubr.msk.bf16.gmra.mrb[20].mxu0 %vm1644_vm15, %v1851_v8  ;;  %v919_v53 = vadd.s32 %v918_v40, %v916_v23  ;;  %vm31_vm15 = vcmask 0  }
 0x41a   :  { %v943_v43 = vpop.xlane.xlu1 %942  ;;  %v929_v5 = vpop.xlane.xlu0 %928  ;;  %32 = vst.msk [vmem:[#allocation4] sm:$0x1] %vm31_vm15, %v1850_v11  ;;  %33 = vst.msk [vmem:[#allocation5] sm:$0x1] %vm31_vm15, %v1850_v11 }
 0x41b   :  { %v944_v51 = vcvt.f32.s32 %v943_v43  ;;  %v930_v57 = vcvt.f32.s32 %v929_v5  ;;  %vm999_vm2 = vcmp.eq.s32.totalorder %v1967_v34, %v905_v41  ;;  %vm1000_vm4 = vcmp.eq.s32.totalorder %v1967_v34, %v919_v53 }
 0x41c   :  { %vm1646_vm3 = vmpackc.low %vm999_vm2, %vm998_vm1 }
 0x41d   :  { %v933_v12 = vadd.s32 %v932_v50, %v930_v57  ;;  %1742 = vmatprep.mubr.msk.bf16.mxu0 %vm1646_vm3, %v1851_v8  ;;  %v947_v16 = vadd.s32 %v946_v2, %v944_v51 }
 0x41e   :  { %v971_v27 = vpop.xlane.xlu1 %970  ;;  %v957_v20 = vpop.xlane.xlu0 %956 }
 0x41f   :  { %v972_v45 = vcvt.f32.s32 %v971_v27  ;;  %v958_v59 = vcvt.f32.s32 %v957_v20  ;;  %vm1001_vm5 = vcmp.eq.s32.totalorder %v1967_v34, %v933_v12  ;;  %vm1002_vm7 = vcmp.eq.s32.totalorder %v1967_v34, %v947_v16 }
 0x420   :  { %vm1648_vm6 = vmpackc.low %vm1001_vm5, %vm1000_vm4 }
 0x421   :  { %v961_v37 = vadd.s32 %v960_v1, %v958_v59  ;;  %1743 = vmatmul.mubr.msk.bf16.gmra.mrb[24].mxu0 %vm1648_vm6, %v1851_v8  ;;  %v975_v39 = vadd.s32 %v974_v15, %v972_v45  ;;  %v1365_v35 = vld [vmem:[#allocation5] sm:$0x1] }
 0x422   :  { %v985_v6 = vpop.xlane.xlu0 %984 }
 0x423   :  { %v986_v9 = vcvt.f32.s32 %v985_v6  ;;  %vm1003_vm8 = vcmp.eq.s32.totalorder %v1967_v34, %v961_v37  ;;  %vm1004_vm10 = vcmp.eq.s32.totalorder %v1967_v34, %v975_v39 }
 0x424   :  { %vm1650_vm9 = vmpackc.low %vm1003_vm8, %vm1002_vm7 }
 0x425   :  { %v989_v44 = vadd.s32 %v988_v7, %v986_v9  ;;  %1746 = vmatprep.mubr.msk.bf16.mxu0 %vm1650_vm9, %v1851_v8 }
 0x426   :  { %v1055_v25 = vpop.xlane.xlu0 %1054 }
 0x427   :  { %vm1005_vm11 = vcmp.eq.s32.totalorder %v1967_v34, %v989_v44 }
 0x428   :  { %vm1652_vm12 = vmpackc.low %vm1005_vm11, %vm1004_vm10 }
 0x429   :  { %1747 = vmatmul.mubr.msk.bf16.gmra.mrb[28].mxu0 %vm1652_vm12, %v1851_v8  ;;  %v1539_v8 = vsel %vm493_vm0, %v1538_v26, 0.0 }
 0x42a   :  { %v1541_v3 = vsel %vm1540_vm14, %v1539_v8, 0.0 }
 0x42f   :  { %v623_v10 = vpop.xlane.xlu1 %622 }
 0x430   :  { %1796 = vlog2.f32 %v623_v10 }
 0x43a   :  { %v1797_v14 = vpop.eup %1796 }
 0x43b   :  { %v655_v18 = vmul.f32 0.6931472, %v1797_v14 }
 0x43d   :  { %v686_v22 = vadd.f32 %v655_v18, %v2196_v47  ;;  %v378_v47 = vpop.f32.mrb[8].mxu1 }
 0x43e   :  { %v380_v34 = vpop.f32.mrb[9].mxu1 }
 0x43f   :  { %v1087_v63 = vsub.f32 %v686_v22, %v1055_v25  ;;  %v381_v49 = vpop.f32.mrb[10].mxu1 }
 0x440   :  { %v383_v54 = vpop.f32.mrb[11].mxu1 }
 0x441   :  { %v1120_v29 = vsel %vm1119_vm13, %v1087_v63, 0.0  ;;  %v386_v58 = vpop.f32.mrb[12].mxu1 }
 0x442   :  { %1151 = vadd.xlane.f32.xlu0 %v1120_v29  ;;  %v388_v61 = vpop.f32.mrb[13].mxu1 }
 0x443   :  { %v389_v60 = vpop.f32.mrb[14].mxu1 }
 0x444   :  { %v391_v56 = vpop.f32.mrb[15].mxu1 }
 0x445   :  { %v394_v32 = vpop.f32.mrb[16].mxu1 }
 0x446   :  { %1542 = vadd.xlane.f32.xlu0 %v1541_v3  ;;  %v396_v38 = vpop.f32.mrb[17].mxu1  ;;  %v1086_v3 = vld [vmem:[#allocation4] sm:$0x1] }
 0x447   :  { %v397_v48 = vpop.f32.mrb[18].mxu1 }
 0x448   :  { %v399_v46 = vpop.f32.mrb[19].mxu1 }
 0x449   :  { %v402_v62 = vpop.f32.mrb[20].mxu1 }
 0x44a   :  { %v404_v33 = vpop.f32.mrb[21].mxu1 }
 0x44b   :  { %v405_v23 = vpop.f32.mrb[22].mxu1 }
 0x44c   :  { %v407_v24 = vpop.f32.mrb[23].mxu1 }
 0x44d   :  { %v410_v40 = vpop.f32.mrb[24].mxu1 }
 0x44e   :  { %v412_v52 = vpop.f32.mrb[25].mxu1 }
 0x44f   :  { %v413_v41 = vpop.f32.mrb[26].mxu1 }
 0x450   :  { %v415_v11 = vpop.f32.mrb[27].mxu1 }
 0x451   :  { %v1334_v30 = vpop.xlane.xlu1 %1333  ;;  %v418_v50 = vpop.f32.mrb[28].mxu1 }
 0x452   :  { %v1382_v31 = vsel %vm1119_vm13, %v1334_v30, 0.0  ;;  %v420_v42 = vpop.f32.mrb[29].mxu1 }
 0x453   :  { %1413 = vadd.xlane.f32.xlu1 %v1382_v31  ;;  %v421_v53 = vpop.f32.mrb[30].mxu1 }
 0x454   :  { %v423_v43 = vpop.f32.mrb[31].mxu1 }
 0x4cf   :  { %v1152_v5 = vpop.xlane.xlu0 %1151 }
 0x4d0   :  { %v1153_v51 = vrot.slane %v1152_v5, 4 }
 0x4d2   :  { %v1154_v57 = vadd.f32 %v1153_v51, %v1152_v5 }
 0x4d3   :  { %v1543_v19 = vpop.xlane.xlu0 %1542 }
 0x4d4   :  { %v1155_v2 = vrot.slane %v1154_v57, 2  ;;  %v1544_v1 = vrot.slane %v1543_v19, 4 }
 0x4d6   :  { %v1156_v12 = vadd.f32 %v1155_v2, %v1154_v57  ;;  %v1545_v20 = vadd.f32 %v1544_v1, %v1543_v19 }
 0x4d8   :  { %v1157_v4 = vrot.slane %v1156_v12, 1  ;;  %v1546_v16 = vrot.slane %v1545_v20, 2 }
 0x4da   :  { %v1158_v27 = vadd.f32 %v1157_v4, %v1156_v12  ;;  %v1547_v37 = vadd.f32 %v1546_v16, %v1545_v20 }
 0x4dc   :  { %1750 = vpush %v1158_v27  ;;  %v1548_v39 = vrot.slane %v1547_v37, 1 }
 0x4de   :  { %v1549_v10 = vadd.f32 %v1548_v39, %v1547_v37 }
 0x4e0   :  { %v1414_v45 = vpop.xlane.xlu1 %1413 }
 0x4e1   :  { %v1415_v59 = vrot.slane %v1414_v45, 4 }
 0x4e3   :  { %v1416_v15 = vadd.f32 %v1415_v59, %v1414_v45 }
 0x4e5   :  { %v1417_v7 = vrot.slane %v1416_v15, 2 }
 0x4e7   :  { %v1418_v6 = vadd.f32 %v1417_v7, %v1416_v15 }
 0x4e9   :  { %v1419_v9 = vrot.slane %v1418_v6, 1 }
 0x4eb   :  { %v1420_v44 = vadd.f32 %v1419_v9, %v1418_v6 }
 0x4ec   :  { %v1740_v0 = vpop.f32.mrb[20].mxu0 }
 0x4ed   :  { %v1222_v13 = vpop.f32.mrb[21].mxu0  ;;  %1752 = vpush %v1420_v44 }
 0x4ee   :  { %1754 = vpush %v1549_v10  ;;  %v1741_v14 = vpop.f32.mrb[22].mxu0 }
 0x4ef   :  { %v1225_v17 = vpop.f32.mrb[23].mxu0 }
 0x4f4   :  { %v1744_v18 = vpop.f32.mrb[24].mxu0 }
 0x4f5   :  { %v1238_v21 = vpop.f32.mrb[25].mxu0 }
 0x4f6   :  { %v1745_v22 = vpop.f32.mrb[26].mxu0 }
 0x4f7   :  { %v1241_v25 = vpop.f32.mrb[27].mxu0 }
 0x4fc   :  { %v1748_v26 = vpop.f32.mrb[28].mxu0 }
 0x4fd   :  { %v1254_v63 = vpop.f32.mrb[29].mxu0 }
 0x4fe   :  { %v1749_v29 = vpop.f32.mrb[30].mxu0 }
 0x4ff   :  { %v1257_v8 = vpop.f32.mrb[31].mxu0 }
 0x50d   :  { %s1751_s0 = spop %1750 }
 0x50e   :  { %v1160_v30 = vstv %s1751_s0 }
 0x50f   :  { %v1161_v31 = vadd.f32 %v1160_v30, %v1086_v3 }
 0x511   :  { %1163 = vst.msk [vmem:[#allocation4] sm:$0x1] %vm31_vm15, %v1161_v31 }
 0x518   :  { %v1554_v49 = vld [vmem:[#allocation4] sm:$0x1] }
 0x51e   :  { %s1753_s20 = spop %1752 }
 0x51f   :  { %v1422_v28 = vstv %s1753_s20  ;;  %s1755_s21 = spop %1754 }
 0x520   :  { %v1423_v36 = vadd.f32 %v1422_v28, %v1365_v35  ;;  %v1551_v55 = vstv %s1755_s21 }
 0x522   :  { %1424 = vst.msk [vmem:[#allocation5] sm:$0x1] %vm31_vm15, %v1423_v36 }
 0x529   :  { %v1552_v47 = vld [vmem:[#allocation5] sm:$0x1] }
 0x52a   :  { %v1553_v34 = vsub.f32 %v1551_v55, %v1552_v47 }
 0x52c   :  { %v1555_v54 = vadd.f32 %v1554_v49, %v1553_v34 }
 0x52e   :  { %v1556_v58 = vmul.f32 0.0625, %v1555_v54 }
 0x530   :  { %1557 = vst.msk [vmem:[#allocation9] sm:$0x1] %vm31_vm15, %v1556_v58 }
 0x531   :  { %1831 = shalt.err (!%p1828_p12)
}
 0x532   :  { %s1832_s28 = scalar_lea.hbm %s2275_s1, 16 }
 0x533   :  { %p1833_p13 = scmp.ne.s32.totalorder %s2275_s1, %s1832_s28  ;;  %p1836_p0 = scmp.lt.u32.totalorder %s1832_s28, %s2275_s1 }
 0x535   :  { %p1838_p1 = pnand %p1836_p0, %p1833_p13 }
 0x537   :  { %1841 = shalt.err (!%p1838_p1)
}
 0x538   :  { %1567 = dma.vmem_to_hbm [thread:$0]  %s1565_s23, 16, %s2275_s1, [#allocation8]  }
 0x539   :  { %1844 = dma.done.wait [#allocation8], 16  }
 0x53a   :  { %1845 = vsyncadd [#allocation8], 4294967280 }
 0x53b   :  { %1571 = vsyncpa [#allocation7], 1 }
 0x53c   :  { %1572 = vsyncpa [#allocation8], 1 }

</bundles_post_ra>
